<compile_context>
chip_gen: v6e
topology: v6e:2x2x1
jax: 0.10.0
libtpu: 0.0.40
codegen_flags: <defaults>
</compile_context>

<pallas_src>
import jax
import jax.numpy as jnp
from jax.experimental import pallas as pl
from jax.experimental.pallas import tpu as pltpu

_EPS = 1e-8


def _round_up(v: int, m: int) -> int:
    return ((v + m - 1) // m) * m


def _vmem_budgets():
    """Generation-aware (total-resident-bytes-for-4-blocks, vmem_limit_bytes)."""
    try:
        cap = int(pltpu.get_tpu_info().vmem_capacity_bytes)
    except Exception:           # unknown chip / query unavailable -> conservative
        cap = 64 << 20
    if cap >= (100 << 20):      # v5e / v6e: 128 MiB VMEM per TensorCore
        return 32 << 20, 64 << 20
    # v7x (64 MiB per TensorCore) or unknown: keep resident footprint modest.
    return 40 << 20, 48 << 20


# --------------------------------------------------------------------------
# Kernels
# --------------------------------------------------------------------------
def _make_scalar_kernel(b_true: int, c_true: int):
    """Single-block kernel: emits the final scalar loss directly."""
    inv_c = 1.0 / float(c_true)
    inv_b = 1.0 / float(b_true)

    def kernel(x_ref, y_ref, out_ref):
        d = x_ref[...].astype(jnp.float32) - y_ref[...].astype(jnp.float32)
        row_mean = jnp.sum(d * d, axis=1, keepdims=True) * jnp.float32(inv_c)
        rmse = jnp.sqrt(row_mean + jnp.float32(_EPS))            # (B, 1)
        out_ref[...] = jnp.sum(rmse, keepdims=True) * jnp.float32(inv_b)

    return kernel


def _make_rows_kernel(c_true: int):
    """grid=(gb,): whole feature axis per step -> per-row RMSE column."""
    inv_c = 1.0 / float(c_true)

    def kernel(x_ref, y_ref, out_ref):
        d = x_ref[...].astype(jnp.float32) - y_ref[...].astype(jnp.float32)
        row_mean = jnp.sum(d * d, axis=1, keepdims=True) * jnp.float32(inv_c)
        out_ref[...] = jnp.sqrt(row_mean + jnp.float32(_EPS))

    return kernel


def _make_tiled_kernel(c_true: int, tc: int, needs_mask: bool):
    """grid=(gb, gc): feature-tiled with an f32 per-row accumulator."""
    inv_c = 1.0 / float(c_true)

    def kernel(x_ref, y_ref, out_ref, acc_ref):
        k = pl.program_id(1)
        nk = pl.num_programs(1)

        @pl.when(k == 0)
        def _init():
            acc_ref[...] = jnp.zeros_like(acc_ref)

        def accumulate(mask_tail):
            d = x_ref[...].astype(jnp.float32) - y_ref[...].astype(jnp.float32)
            if mask_tail:
                # Ragged last feature block: zero the out-of-range lanes so
                # per-row sums see only the true C columns (no wrapper pad).
                col = jax.lax.broadcasted_iota(jnp.int32, d.shape, 1)
                d = jnp.where(col + k * tc < c_true, d, 0.0)
            acc_ref[...] += jnp.sum(d * d, axis=1, keepdims=True)

        if needs_mask:
            @pl.when(k == nk - 1)
            def _tail():
                accumulate(True)

            @pl.when(k < nk - 1)
            def _body():
                accumulate(False)
        else:
            accumulate(False)

        @pl.when(k == nk - 1)
        def _finalize():
            out_ref[...] = jnp.sqrt(acc_ref[...] * jnp.float32(inv_c)
                                    + jnp.float32(_EPS))

    return kernel


# --------------------------------------------------------------------------
# Wrapper
# --------------------------------------------------------------------------
def rmse_loss(x: jax.Array, y: jax.Array, *, _per_block_bytes=None) -> jax.Array:
    """Pallas implementation of RMSELoss.forward. Returns a float32 scalar."""
    assert x.shape == y.shape and x.ndim == 2
    B, C = x.shape
    itemsize = jnp.dtype(x.dtype).itemsize
    sub_q = max(8, 32 // itemsize)          # dtype-aware sublane quantum

    budget, vmem_limit = _vmem_budgets()
    per_block = _per_block_bytes if _per_block_bytes is not None else budget // 4

    cparams = dict(vmem_limit_bytes=vmem_limit)
    cost = pl.CostEstimate(
        flops=3 * B * C,
        transcendentals=B,
        bytes_accessed=2 * B * C * itemsize + 4 * B + 4,
    )

    # ---- Path A: tiny problem -> single block, scalar straight out --------
    if B * C * itemsize <= min(per_block, 1 << 20):
        out = pl.pallas_call(
            _make_scalar_kernel(B, C),
            out_shape=jax.ShapeDtypeStruct((1, 1), jnp.float32),
            compiler_params=pltpu.CompilerParams(**cparams),
            cost_estimate=cost,
        )(x, y)
        return out[0, 0]

    rows_per_block = per_block // max(1, C * itemsize)

    if rows_per_block >= sub_q:
        # ---- Path B: full feature axis per step, batch-tiled only ---------
        tc = C                               # full dim -> no mask needed
        cap = (rows_per_block // sub_q) * sub_q
        if cap >= B:
            half = max(sub_q, _round_up(-(-B // 2), sub_q))
            if half < B and half * C * itemsize >= (1 << 20):
                tb = half                    # >=2 blocks: both v7x TCs stream
            else:
                tb = B                       # one full-batch block (legal)
        else:
            tb = cap
        gb = pl.cdiv(B, tb)

        rows = pl.pallas_call(
            _make_rows_kernel(C),
            out_shape=jax.ShapeDtypeStruct((B, 1), jnp.float32),
            grid_spec=pltpu.PrefetchScalarGridSpec(
                num_scalar_prefetch=0,
                grid=(gb,),
                in_specs=[pl.BlockSpec((tb, tc), lambda i: (i, 0)),
                          pl.BlockSpec((tb, tc), lambda i: (i, 0))],
                out_specs=pl.BlockSpec((tb, 1), lambda i: (i, 0)),
            ),
            compiler_params=pltpu.CompilerParams(
                dimension_semantics=("parallel",), **cparams),
            cost_estimate=cost,
        )(x, y)
    else:
        # ---- Path C: very wide rows -> tile the feature axis too ----------
        tb = 64 if B >= 64 else B            # ==B is legal (full-dim block)
        tc = (per_block // (tb * itemsize) // 128) * 128
        tc = max(128, tc)
        if tc >= C:
            tc = C
        gb = pl.cdiv(B, tb)
        gc = pl.cdiv(C, tc)
        needs_mask = (C % tc) != 0

        rows = pl.pallas_call(
            _make_tiled_kernel(C, tc, needs_mask),
            out_shape=jax.ShapeDtypeStruct((B, 1), jnp.float32),
            grid_spec=pltpu.PrefetchScalarGridSpec(
                num_scalar_prefetch=0,
                grid=(gb, gc),               # reduction (feature) axis last
                in_specs=[pl.BlockSpec((tb, tc), lambda i, k: (i, k)),
                          pl.BlockSpec((tb, tc), lambda i, k: (i, k))],
                out_specs=pl.BlockSpec((tb, 1), lambda i, k: (i, 0)),
                scratch_shapes=[pltpu.VMEM((tb, 1), jnp.float32)],
            ),
            compiler_params=pltpu.CompilerParams(
                dimension_semantics=("parallel", "arbitrary"), **cparams),
            cost_estimate=cost,
        )(x, y)

    # Tiny final batch mean kept in the wrapper for large B (preserves the
    # batch-parallel grid); the tiny-problem case folds it in-kernel above.
    return jnp.sum(rows) * jnp.float32(1.0 / B)


if __name__ == "__main__":
    key = jax.random.PRNGKey(0)
    kx, ky = jax.random.split(key)

    def ref_loss(a, b):
        af, bf = a.astype(jnp.float32), b.astype(jnp.float32)
        return jnp.mean(jnp.sqrt(jnp.mean((af - bf) ** 2, axis=1) + 1e-8))

    # 1) Module-scale case (single-block scalar path).
    B, C = 8, 32
    x = jax.random.normal(kx, (B, C), dtype=jnp.float32)
    y = jax.random.normal(ky, (B, C), dtype=jnp.float32)
    loss = jax.block_until_ready(rmse_loss(x, y))
    assert jnp.allclose(loss, ref_loss(x, y), rtol=1e-5, atol=1e-6), loss

    # 2) Batch-tiled path with a ragged batch (no padding), exercised via a
    #    small forced per-block budget so shapes stay tiny.
    B2, C2 = 10, 256
    x2 = jax.random.normal(kx, (B2, C2), dtype=jnp.float32)
    y2 = jax.random.normal(ky, (B2, C2), dtype=jnp.float32)
    loss2 = jax.block_until_ready(rmse_loss(x2, y2, _per_block_bytes=8 * 1024))
    assert jnp.allclose(loss2, ref_loss(x2, y2), rtol=1e-5, atol=1e-6), loss2

    # 3) Feature-tiled path with a ragged (in-kernel masked) feature tail,
    #    native bf16 streaming.
    B3, C3 = 16, 1000
    x3 = jax.random.normal(kx, (B3, C3), dtype=jnp.bfloat16)
    y3 = jax.random.normal(ky, (B3, C3), dtype=jnp.bfloat16)
    loss3 = jax.block_until_ready(rmse_loss(x3, y3, _per_block_bytes=4 * 1024))
    assert jnp.allclose(loss3, ref_loss(x3, y3), rtol=1e-4, atol=1e-5), loss3

    print("KERNEL_OK")
</pallas_src>

<mosaic_0001>
module attributes {stable_mosaic.version = 11 : i64} {
  func.func @kernel(%arg0: memref<8x32xf32, #tpu.memory_space<vmem>>, %arg1: memref<8x32xf32, #tpu.memory_space<vmem>>, %arg2: memref<1x1xf32, #tpu.memory_space<vmem>>) attributes {dimension_semantics = [], scalar_prefetch = 0 : i64, scratch_operands = 0 : i64, tpu.core_type = #tpu.core_type<tc>} {
    %c0 = arith.constant 0 : index
    %c0_0 = arith.constant 0 : index
    %0 = vector.load %arg0[%c0, %c0_0] : memref<8x32xf32, #tpu.memory_space<vmem>>, vector<8x32xf32>
    %c0_1 = arith.constant 0 : index
    %c0_2 = arith.constant 0 : index
    %1 = vector.load %arg1[%c0_1, %c0_2] : memref<8x32xf32, #tpu.memory_space<vmem>>, vector<8x32xf32>
    %2 = arith.subf %0, %1 : vector<8x32xf32>
    %3 = arith.mulf %2, %2 : vector<8x32xf32>
    %cst = arith.constant dense<0.000000e+00> : vector<8xf32>
    %4 = vector.multi_reduction <add>, %3, %cst [1] : vector<8x32xf32> to vector<8xf32>
    %5 = vector.shape_cast %4 : vector<8xf32> to vector<8x1xf32>
    %cst_3 = arith.constant 3.125000e-02 : f32
    %6 = vector.broadcast %cst_3 : f32 to vector<8x1xf32>
    %7 = arith.mulf %5, %6 : vector<8x1xf32>
    %cst_4 = arith.constant 9.99999993E-9 : f32
    %8 = vector.broadcast %cst_4 : f32 to vector<8x1xf32>
    %9 = arith.addf %7, %8 : vector<8x1xf32>
    %10 = math.sqrt %9 : vector<8x1xf32>
    %11 = vector.shape_cast %10 : vector<8x1xf32> to vector<1x8x1xf32>
    %cst_5 = arith.constant dense<0.000000e+00> : vector<1xf32>
    %12 = vector.multi_reduction <add>, %11, %cst_5 [1, 2] : vector<1x8x1xf32> to vector<1xf32>
    %13 = vector.shape_cast %12 : vector<1xf32> to vector<1x1x1xf32>
    %14 = vector.extract %13[0, 0, 0] : f32 from vector<1x1x1xf32>
    %15 = vector.broadcast %14 : f32 to vector<1x1xf32>
    %cst_6 = arith.constant 1.250000e-01 : f32
    %16 = vector.broadcast %cst_6 : f32 to vector<1x1xf32>
    %17 = arith.mulf %15, %16 : vector<1x1xf32>
    %c0_7 = arith.constant 0 : index
    %c0_8 = arith.constant 0 : index
    %18 = vector.load %arg2[%c0_7, %c0_8] : memref<1x1xf32, #tpu.memory_space<vmem>>, vector<1x1xf32>
    tpu.vector_store %arg2[%c0_7, %c0_8], %17 {strides = array<i32>} : memref<1x1xf32, #tpu.memory_space<vmem>>, vector<1x1xf32>,
    return
  }
}

</mosaic_0001>

<bundles_post_ra>
// kernel: tpu_custom_call.1
= control target key start
LH: loop header
LB: loop body
LE: loop exit
PB: predicated region body
PF: predicated region fallthrough
CT: control target
= control target key end

     0   :  { %7 = vsyncpa [#allocation3], 0  ;;  %s184_s0 = inlined_call_operand.hbm [shape: f32[8,32], index: 0, kind: input, shape index: {}]   ;;  %s185_s1 = inlined_call_operand.hbm [shape: f32[8,32], index: 1, kind: input, shape index: {}]   ;;  %s186_s2 = inlined_call_operand.hbm [shape: f32[1,1], index: 2, kind: output, shape index: {}]  }
   0x1   :  { %8 = vsyncpa [#allocation6], 0 }
   0x2   :  { %9 = vsyncpa [#allocation4], 0  ;;  %s157_s9 = smov [#allocation2]   ;;  %s158_s11 = smov [#allocation5]  }
   0x3   :  { %s16_s10 = sshll.u32 %s157_s9, 4  ;;  %s26_s12 = sshll.u32 %s158_s11, 4  ;;  %s17_s10 = int_to_ptr.vmem [resolvable:$true] %s16_s10  ;;  %s27_s12 = int_to_ptr.vmem [resolvable:$true] %s26_s12 }
   0x4   :  { %s99_s13 = scalar_lea.vmem %s17_s10, 128  ;;  %p104_p1 = scmp.lt.s32.totalorder %s17_s10, %s17_s10 }
   0x5   :  { %p100_p0 = scmp.ne.s32.totalorder %s17_s10, %s99_s13  ;;  %p105_p2 = scmp.lt.s32.totalorder %s99_s13, %s99_s13 }
   0x7   :  { %p106_p3 = por %p105_p2, %p104_p1 }
   0x9   :  { %p107_p4 = pnand %p106_p3, %p100_p0 }
   0xb   :  { %110 = shalt.err (!%p107_p4)
}
   0xc   :  { %19 = dma.hbm_to_vmem [thread:$0]  %s184_s0, 128, %s17_s10, [#allocation3]  }
   0xd   :  { %s119_s16 = scalar_lea.vmem %s27_s12, 128  ;;  %p124_p6 = scmp.lt.s32.totalorder %s27_s12, %s27_s12 }
   0xe   :  { %p120_p5 = scmp.ne.s32.totalorder %s27_s12, %s119_s16  ;;  %p125_p7 = scmp.lt.s32.totalorder %s119_s16, %s119_s16 }
  0x10   :  { %p126_p8 = por %p125_p7, %p124_p6 }
  0x12   :  { %p127_p9 = pnand %p126_p8, %p120_p5 }
  0x14   :  { %130 = shalt.err (!%p127_p9)
}
  0x15   :  { %29 = dma.hbm_to_vmem [thread:$0]  %s185_s1, 128, %s27_s12, [#allocation6]  }
  0x16   :  { %151 = dma.done.wait [#allocation3], 128  }
  0x17   :  { %152 = vsyncadd [#allocation3], 4294967168 }
  0x18   :  { %153 = dma.done.wait [#allocation6], 128  }
  0x19   :  { %154 = vsyncadd [#allocation6], 4294967168  ;;  %v36_v0 = vld [vmem:[#allocation2] sm:$0xff]  ;;  %v37_v1 = vld [vmem:[#allocation5] sm:$0xff]  ;;  %vm40_vm0 = vcmask 261120   ;;  %vm53_vm2 = vcmask 7168  }
  0x1a   :  { %v38_v2 = vsub.f32 %v36_v0, %v37_v1  ;;  %s159_s0 = smov [#allocation7]   ;;  %vm66_vm4 = vcmask 0  }
  0x1b   :  { %s74_s1 = sshll.u32 %s159_s0, 4  ;;  %s75_s1 = int_to_ptr.vmem [resolvable:$true] %s74_s1 }
  0x1c   :  { %v39_v3 = vmul.f32 %v38_v2, %v38_v2  ;;  %s131_s20 = scalar_lea.vmem %s75_s1, 16  ;;  %s135_s21 = scalar_lea.vmem %s75_s1, 32 }
  0x1d   :  { %p132_p10 = scmp.ne.s32.totalorder %s75_s1, %s131_s20  ;;  %p136_p11 = scmp.lt.s32.totalorder %s75_s1, %s75_s1 }
  0x1e   :  { %v41_v4 = vsel %vm40_vm0, %v39_v3, 0.0  ;;  %p137_p12 = scmp.lt.s32.totalorder %s135_s21, %s131_s20 }
  0x1f   :  { %42 = vadd.xlane.f32.xlu0 %v41_v4 }
  0x20   :  { %p138_p13 = por %p137_p12, %p136_p11 }
  0x22   :  { %p139_p0 = pnand %p138_p13, %p132_p10 }
  0xa8   :  { %v43_v5 = vpop.xlane.xlu0 %42 }
  0xa9   :  { %v44_v6 = vmul.f32 0.03125, %v43_v5 }
  0xab   :  { %v45_v7 = vadd.f32 1e-08, %v44_v6 }
  0xad   :  { %89 = vrsqrt.f32 %v45_v7  ;;  %vm48_vm1 = vcmp.eq.f32.partialorder %v45_v7, inf  ;;  %v51_v10 = vand.u32 2147483648, %v45_v7  ;;  %vm50_vm3 = vcmp.eq.f32.partialorder %v45_v7, 0.0 }
  0xba   :  { %v90_v8 = vpop.eup %89 }
  0xbb   :  { %v47_v9 = vmul.f32 %v90_v8, %v45_v7 }
  0xbd   :  { %v49_v11 = vsel %vm48_vm1, %v45_v7, %v47_v9 }
  0xbe   :  { %v52_v12 = vsel %vm50_vm3, %v51_v10, %v49_v11 }
  0xbf   :  { %v54_v13 = vsel %vm53_vm2, %v52_v12, 0.0 }
  0xc0   :  { %55 = vadd.xlane.f32.xlu0 %v54_v13 }
 0x149   :  { %v56_v14 = vpop.xlane.xlu0 %55 }
 0x14a   :  { %v57_v15 = vrot.slane %v56_v14, 4 }
 0x14c   :  { %v58_v16 = vadd.f32 %v57_v15, %v56_v14 }
 0x14e   :  { %v59_v17 = vrot.slane %v58_v16, 2 }
 0x150   :  { %v60_v18 = vadd.f32 %v59_v17, %v58_v16 }
 0x152   :  { %v61_v19 = vrot.slane %v60_v18, 1 }
 0x154   :  { %v62_v20 = vadd.f32 %v61_v19, %v60_v18 }
 0x156   :  { %84 = vpush %v62_v20 }
 0x187   :  { %s85_s19 = spop %84 }
 0x188   :  { %v64_v21 = vstv %s85_s19 }
 0x189   :  { %v65_v22 = vmul.f32 0.125, %v64_v21 }
 0x18b   :  { %67 = vst.msk [vmem:[#allocation7] sm:$0x1] %vm66_vm4, %v65_v22 }
 0x18c   :  { %142 = shalt.err (!%p139_p0)
}
 0x18d   :  { %77 = dma.vmem_to_hbm [thread:$0]  %s75_s1, 16, %s186_s2, [#allocation4]  }
 0x18e   :  { %155 = dma.done.wait [#allocation4], 16  }
 0x18f   :  { %156 = vsyncadd [#allocation4], 4294967280 }
 0x190   :  { %81 = vsyncpa [#allocation3], 1 }
 0x191   :  { %82 = vsyncpa [#allocation6], 1 }
 0x192   :  { %83 = vsyncpa [#allocation4], 1 }

</bundles_post_ra>
